<compile_context>
chip_gen: v7x
topology: tpu7x:2x2x1
jax: 0.10.0
libtpu: 0.0.40
codegen_flags: <defaults>
</compile_context>

<pallas_src>
import functools

import jax
import jax.numpy as jnp
from jax.experimental import pallas as pl
from jax.experimental.pallas import tpu as pltpu

LN_EPS = 0.001
UPDATE_BIAS = -1.0
LANE = 128


def _round_up(n, m):
    return ((n + m - 1) // m) * m


def _cdiv(a, b):
    return (a + b - 1) // b


def _sublane(dtype):
    # f32 -> 8 rows per vreg sublane group, bf16 -> 16, int8/fp8 -> 32.
    return max(8, 32 // jnp.dtype(dtype).itemsize)


def _vmem_limit_bytes():
    # Generation-aware: ~3/4 of physical VMEM, capped at 100 MiB.
    # v5e/v6e (128 MiB) -> 96 MiB, v7x (64 MiB per TensorCore) -> 48 MiB.
    try:
        cap = pltpu.get_tpu_info().vmem_capacity_bytes
    except Exception:
        cap = 64 << 20  # conservative (v7x per-TC physical)
    return int(min(100 << 20, max(32 << 20, (cap * 3) // 4)))


def _batch_tiles(batch, sublane, h_pad):
    # Pick nb first (avoids padding e.g. B=300 up to 512), keep tiles sublane-aligned,
    # and prefer nb >= 2 so the "parallel" batch axis can shard across v7x's 2 TCs.
    # Smaller max tile when the gate width is huge (v7x VMEM pressure).
    max_tile = 128 if h_pad >= 2048 else 256
    nb = _cdiv(batch, max_tile)
    if nb < 2 and batch >= 2 * sublane:
        nb = 2
    tb = _round_up(_cdiv(batch, nb), sublane)
    nb = _cdiv(batch, tb)
    return tb, nb, nb * tb


def _pack_gates_lanewise(a, hidden, h_pad):
    # (..., 3*hidden) -> (..., 3*h_pad): each gate gets its own lane-aligned block;
    # padding columns are exactly zero (keeps the unmasked LayerNorm sums valid).
    lead = a.shape[:-1]
    a = a.reshape(lead + (3, hidden))
    a = jnp.pad(a, [(0, 0)] * len(lead) + [(0, 0), (0, h_pad - hidden)])
    return a.reshape(lead + (3 * h_pad,))


def _pack_params(w_ih, w_hh, ln_w, ln_b, hidden, h_pad, matmul_dtype):
    # NOTE: in multi-step use this repack should be hoisted out of any outer loop.
    g = 3 * h_pad
    wih = _pack_gates_lanewise(w_ih, hidden, h_pad)                  # (D, G)
    whh = _pack_gates_lanewise(w_hh, hidden, h_pad)                  # (H, G)
    whh = jnp.pad(whh, ((0, h_pad - hidden), (0, 0)))                # (H_pad, G)
    if matmul_dtype is not None:
        wih = wih.astype(matmul_dtype)
        whh = whh.astype(matmul_dtype)
    lnw = _pack_gates_lanewise(ln_w.astype(jnp.float32), hidden, h_pad).reshape(1, g)
    # Fold the GRU update bias into the update-gate third of the LN beta.
    lnb3 = ln_b.astype(jnp.float32).reshape(3, hidden).at[1].add(UPDATE_BIAS)
    lnb = jnp.pad(lnb3, ((0, 0), (0, h_pad - hidden))).reshape(1, g)
    return wih, whh, lnw, lnb


def _resident(block_shape, index_map, single_buffer):
    # Constant-index (VMEM-resident) operand: single-buffer it when supported.
    if single_buffer:
        return pl.BlockSpec(block_shape, index_map, pipeline_mode=pl.Buffered(1))
    return pl.BlockSpec(block_shape, index_map)


def _ln_gru_tail(gates, h_f32, lnw, lnb, hidden, h_pad):
    # gates: (tb, 3*h_pad) f32.  Padded gate columns are exactly zero (zero weight /
    # gamma / beta padding), so the LayerNorm sums need no mask and the padded part of
    # the output state stays zero.
    inv_n = 1.0 / (3 * hidden)
    s1 = jnp.sum(gates, axis=-1, keepdims=True)
    s2 = jnp.sum(gates * gates, axis=-1, keepdims=True)
    mean = s1 * inv_n
    var = s2 * inv_n - mean * mean                  # fine in f32 at these scales
    gates = (gates - mean) * jax.lax.rsqrt(var + LN_EPS)
    gates = gates * lnw + lnb                       # UPDATE_BIAS already folded into lnb
    reset = jax.nn.sigmoid(gates[:, 0 * h_pad:1 * h_pad])
    update = jax.nn.sigmoid(gates[:, 1 * h_pad:2 * h_pad])
    newval = jnp.tanh(reset * gates[:, 2 * h_pad:3 * h_pad])
    return h_f32 + update * (newval - h_f32)        # == update*newval + (1-update)*h


# ----------------------------- single-step cell --------------------------------------


def _cell_kernel(x_ref, h_ref, wih_ref, whh_ref, lnw_ref, lnb_ref, out_ref, *,
                 hidden, h_pad):
    h = h_ref[...]
    gates = jnp.dot(x_ref[...].astype(wih_ref.dtype), wih_ref[...],
                    preferred_element_type=jnp.float32)
    gates = gates + jnp.dot(h.astype(whh_ref.dtype), whh_ref[...],
                            preferred_element_type=jnp.float32)
    out = _ln_gru_tail(gates, h.astype(jnp.float32), lnw_ref[...], lnb_ref[...],
                       hidden, h_pad)
    out_ref[...] = out.astype(out_ref.dtype)


def norm_gru_cell_late_reset(x, state, w_ih, w_hh, ln_w, ln_b, *, matmul_dtype=None):
    """Single-step NormGRUCellLateReset forward.

    x: (B, input_size), state: (B, hidden).
    w_ih: (input_size, 3*hidden), w_hh: (hidden, 3*hidden) (pre-transposed nn.Linear
    weights so the kernel computes activation @ W), ln_w / ln_b: (3*hidden,).
    matmul_dtype: optional dtype (e.g. jnp.bfloat16) for the MXU operands; post-matmul
    math stays f32.  Returns the new hidden state (B, hidden).
    """
    B, D = x.shape
    B2, H = state.shape
    assert B2 == B
    h_pad = _round_up(H, LANE)
    G = 3 * h_pad
    sub = max(_sublane(x.dtype), _sublane(state.dtype))
    tb, nb, b_pad = _batch_tiles(B, sub, h_pad)

    wih, whh, lnw, lnb = _pack_params(w_ih, w_hh, ln_w, ln_b, H, h_pad, matmul_dtype)
    xp = jnp.pad(x, ((0, b_pad - B), (0, 0)))               # batch pad only, D untouched
    hp = jnp.pad(state, ((0, b_pad - B), (0, h_pad - H)))   # lane-align h once

    kernel = functools.partial(_cell_kernel, hidden=H, h_pad=h_pad)

    def build_and_call(single_buffer):
        return pl.pallas_call(
            kernel,
            out_shape=jax.ShapeDtypeStruct((b_pad, h_pad), state.dtype),
            grid_spec=pltpu.PrefetchScalarGridSpec(
                num_scalar_prefetch=0,
                grid=(nb,),
                in_specs=[
                    pl.BlockSpec((tb, D), lambda i: (i, 0)),       # x tile, streamed
                    pl.BlockSpec((tb, h_pad), lambda i: (i, 0)),   # h tile, streamed once
                    _resident((D, G), lambda i: (0, 0), single_buffer),      # W_ih
                    _resident((h_pad, G), lambda i: (0, 0), single_buffer),  # W_hh
                    _resident((1, G), lambda i: (0, 0), single_buffer),      # LN gamma
                    _resident((1, G), lambda i: (0, 0), single_buffer),      # LN beta(+bias)
                ],
                out_specs=pl.BlockSpec((tb, h_pad), lambda i: (i, 0)),
            ),
            compiler_params=pltpu.CompilerParams(
                dimension_semantics=("parallel",),
                vmem_limit_bytes=_vmem_limit_bytes(),
            ),
        )(xp, hp, wih, whh, lnw, lnb)

    try:
        out = build_and_call(True)
    except Exception:
        # Fallback for jax builds without BlockSpec(pipeline_mode=pl.Buffered(1)).
        out = build_and_call(False)
    return out[:B, :H]


# ----------------------------- in-kernel time scan -----------------------------------


def _scan_kernel(xproj_ref, h0_ref, whh_ref, lnw_ref, lnb_ref, out_ref, h_sc, *,
                 hidden, h_pad):
    t = pl.program_id(1)

    @pl.when(t == 0)
    def _():
        h_sc[...] = h0_ref[...].astype(jnp.float32)

    h = h_sc[...]
    gates = xproj_ref[0] + jnp.dot(h.astype(whh_ref.dtype), whh_ref[...],
                                   preferred_element_type=jnp.float32)
    h_new = _ln_gru_tail(gates, h, lnw_ref[...], lnb_ref[...], hidden, h_pad)
    h_sc[...] = h_new
    out_ref[0] = h_new.astype(out_ref.dtype)


def norm_gru_late_reset_sequence(x_seq, state, w_ih, w_hh, ln_w, ln_b, *,
                                 matmul_dtype=None):
    """Runs the cell over a whole (T, B, input_size) sequence inside ONE pallas_call.

    x @ W_ih is hoisted out of the recurrence (one (T*B, D) @ (D, 3H) matmul up front);
    W_hh and the LN params stay VMEM-resident across all T steps (constant index_map,
    single-buffered).  Returns all hidden states, shape (T, B, hidden).
    """
    T, B, D = x_seq.shape
    B2, H = state.shape
    assert B2 == B
    h_pad = _round_up(H, LANE)
    G = 3 * h_pad
    sub = max(_sublane(x_seq.dtype), _sublane(state.dtype))
    tb, nb, b_pad = _batch_tiles(B, sub, h_pad)

    wih, whh, lnw, lnb = _pack_params(w_ih, w_hh, ln_w, ln_b, H, h_pad, matmul_dtype)

    # Hoisted input projection: one big matmul, outside the recurrence.
    x2d = x_seq.reshape(T * B, D)
    if matmul_dtype is not None:
        x2d = x2d.astype(matmul_dtype)
    xproj = jnp.dot(x2d, wih, preferred_element_type=jnp.float32).reshape(T, B, G)
    xproj = jnp.pad(xproj, ((0, 0), (0, b_pad - B), (0, 0)))

    hp = jnp.pad(state, ((0, b_pad - B), (0, h_pad - H)))

    kernel = functools.partial(_scan_kernel, hidden=H, h_pad=h_pad)

    def build_and_call(single_buffer):
        return pl.pallas_call(
            kernel,
            out_shape=jax.ShapeDtypeStruct((T, b_pad, h_pad), state.dtype),
            grid_spec=pltpu.PrefetchScalarGridSpec(
                num_scalar_prefetch=0,
                grid=(nb, T),                      # recurrence axis last, "arbitrary"
                in_specs=[
                    pl.BlockSpec((1, tb, G), lambda b, t: (t, b, 0)),   # x@W_ih per step
                    pl.BlockSpec((tb, h_pad), lambda b, t: (b, 0)),     # h0 (read at t==0)
                    _resident((h_pad, G), lambda b, t: (0, 0), single_buffer),  # W_hh
                    _resident((1, G), lambda b, t: (0, 0), single_buffer),      # LN gamma
                    _resident((1, G), lambda b, t: (0, 0), single_buffer),      # LN beta
                ],
                out_specs=pl.BlockSpec((1, tb, h_pad), lambda b, t: (t, b, 0)),
                scratch_shapes=[pltpu.VMEM((tb, h_pad), jnp.float32)],  # carried h state
            ),
            compiler_params=pltpu.CompilerParams(
                dimension_semantics=("parallel", "arbitrary"),
                vmem_limit_bytes=_vmem_limit_bytes(),
            ),
        )(xproj, hp, whh, lnw, lnb)

    try:
        out = build_and_call(True)
    except Exception:
        out = build_and_call(False)
    return out[:, :B, :H]


# ----------------------------- reference & test --------------------------------------


def _reference_cell(x, state, w_ih, w_hh, ln_w, ln_b):
    gates = x @ w_ih + state @ w_hh
    mean = jnp.mean(gates, axis=-1, keepdims=True)
    var = jnp.mean((gates - mean) ** 2, axis=-1, keepdims=True)
    gates = (gates - mean) / jnp.sqrt(var + LN_EPS) * ln_w + ln_b
    hidden = state.shape[-1]
    reset = jax.nn.sigmoid(gates[:, :hidden])
    update = jax.nn.sigmoid(gates[:, hidden:2 * hidden] + UPDATE_BIAS)
    newval = jnp.tanh(reset * gates[:, 2 * hidden:])
    return update * newval + (1.0 - update) * state


if __name__ == "__main__":
    batch, input_size, hidden_size, seq_len = 8, 16, 32, 6

    key = jax.random.PRNGKey(0)
    kx, kh, kwi, kwh, kg, kb, ks = jax.random.split(key, 7)

    x = jax.random.normal(kx, (batch, input_size), jnp.float32)
    state = jax.random.normal(kh, (batch, hidden_size), jnp.float32)
    # Deterministic synthetic params (nn.Linear weights stored pre-transposed: x @ W).
    w_ih = 0.1 * jax.random.normal(kwi, (input_size, 3 * hidden_size), jnp.float32)
    w_hh = 0.1 * jax.random.normal(kwh, (hidden_size, 3 * hidden_size), jnp.float32)
    ln_w = 1.0 + 0.01 * jax.random.normal(kg, (3 * hidden_size,), jnp.float32)
    ln_b = 0.01 * jax.random.normal(kb, (3 * hidden_size,), jnp.float32)

    # --- single-step cell (the module's forward) -------------------------------------
    out = jax.block_until_ready(
        norm_gru_cell_late_reset(x, state, w_ih, w_hh, ln_w, ln_b))
    ref = _reference_cell(x, state, w_ih, w_hh, ln_w, ln_b)
    assert out.shape == (batch, hidden_size)
    assert jnp.allclose(out, ref, atol=1e-4, rtol=1e-4), "cell mismatch vs reference"

    # --- time-step recurrence inside one pallas_call ----------------------------------
    x_seq = jax.random.normal(ks, (seq_len, batch, input_size), jnp.float32)
    outs = jax.block_until_ready(
        norm_gru_late_reset_sequence(x_seq, state, w_ih, w_hh, ln_w, ln_b))
    h = state
    refs = []
    for t in range(seq_len):
        h = _reference_cell(x_seq[t], h, w_ih, w_hh, ln_w, ln_b)
        refs.append(h)
    refs = jnp.stack(refs)
    assert outs.shape == (seq_len, batch, hidden_size)
    assert jnp.allclose(outs, refs, atol=1e-4, rtol=1e-4), "scan mismatch vs reference"

    print("KERNEL_OK")
</pallas_src>

<mosaic_0001>
module attributes {stable_mosaic.version = 11 : i64} {
  func.func @_cell_kernel(%arg0: i32, %arg1: memref<8x16xf32, #tpu.memory_space<vmem>>, %arg2: memref<8x128xf32, #tpu.memory_space<vmem>>, %arg3: memref<16x384xf32, #tpu.memory_space<vmem>>, %arg4: memref<128x384xf32, #tpu.memory_space<vmem>>, %arg5: memref<1x384xf32, #tpu.memory_space<vmem>>, %arg6: memref<1x384xf32, #tpu.memory_space<vmem>>, %arg7: memref<8x128xf32, #tpu.memory_space<vmem>>) attributes {dimension_semantics = [#tpu.dimension_semantics<parallel>], iteration_bounds = array<i64: 1>, scalar_prefetch = 0 : i64, scratch_operands = 0 : i64, tpu.core_type = #tpu.core_type<tc>, window_params = [{transform_indices = @transform_0, window_bounds = array<i64: 8, 16>}, {transform_indices = @transform_1, window_bounds = array<i64: 8, 128>}, {pipeline_mode = #tpu.pipeline_mode<synchronous>, transform_indices = @transform_2, window_bounds = array<i64: 16, 384>}, {pipeline_mode = #tpu.pipeline_mode<synchronous>, transform_indices = @transform_3, window_bounds = array<i64: 128, 384>}, {pipeline_mode = #tpu.pipeline_mode<synchronous>, transform_indices = @transform_4, window_bounds = array<i64: 1, 384>}, {pipeline_mode = #tpu.pipeline_mode<synchronous>, transform_indices = @transform_5, window_bounds = array<i64: 1, 384>}, {transform_indices = @transform_6, window_bounds = array<i64: 8, 128>}]} {
    %c0 = arith.constant 0 : index
    %c0_0 = arith.constant 0 : index
    %0 = vector.load %arg2[%c0, %c0_0] : memref<8x128xf32, #tpu.memory_space<vmem>>, vector<8x128xf32>
    %c0_1 = arith.constant 0 : index
    %c0_2 = arith.constant 0 : index
    %1 = vector.load %arg1[%c0_1, %c0_2] : memref<8x16xf32, #tpu.memory_space<vmem>>, vector<8x16xf32>
    %c0_3 = arith.constant 0 : index
    %c0_4 = arith.constant 0 : index
    %2 = vector.load %arg3[%c0_3, %c0_4] : memref<16x384xf32, #tpu.memory_space<vmem>>, vector<16x384xf32>
    %cst = arith.constant dense<0.000000e+00> : vector<8x384xf32>
    %3 = tpu.matmul %1, %2, %cst {dimension_numbers = #tpu.dot_dimension_numbers<[1], [0], [0], [1], [0, 0, 1, 1], [], []>} : vector<8x16xf32>, vector<16x384xf32>, vector<8x384xf32> -> vector<8x384xf32>
    %c0_5 = arith.constant 0 : index
    %c0_6 = arith.constant 0 : index
    %4 = vector.load %arg4[%c0_5, %c0_6] : memref<128x384xf32, #tpu.memory_space<vmem>>, vector<128x384xf32>
    %cst_7 = arith.constant dense<0.000000e+00> : vector<8x384xf32>
    %5 = tpu.matmul %0, %4, %cst_7 {dimension_numbers = #tpu.dot_dimension_numbers<[1], [0], [0], [1], [0, 0, 1, 1], [], []>} : vector<8x128xf32>, vector<128x384xf32>, vector<8x384xf32> -> vector<8x384xf32>
    %6 = arith.addf %3, %5 : vector<8x384xf32>
    %c0_8 = arith.constant 0 : index
    %c0_9 = arith.constant 0 : index
    %7 = vector.load %arg5[%c0_8, %c0_9] : memref<1x384xf32, #tpu.memory_space<vmem>>, vector<1x384xf32>
    %c0_10 = arith.constant 0 : index
    %c0_11 = arith.constant 0 : index
    %8 = vector.load %arg6[%c0_10, %c0_11] : memref<1x384xf32, #tpu.memory_space<vmem>>, vector<1x384xf32>
    %cst_12 = arith.constant dense<0.000000e+00> : vector<8xf32>
    %9 = vector.multi_reduction <add>, %6, %cst_12 [1] : vector<8x384xf32> to vector<8xf32>
    %10 = vector.shape_cast %9 : vector<8xf32> to vector<8x1xf32>
    %11 = arith.mulf %6, %6 : vector<8x384xf32>
    %cst_13 = arith.constant dense<0.000000e+00> : vector<8xf32>
    %12 = vector.multi_reduction <add>, %11, %cst_13 [1] : vector<8x384xf32> to vector<8xf32>
    %13 = vector.shape_cast %12 : vector<8xf32> to vector<8x1xf32>
    %cst_14 = arith.constant 0.010416667 : f32
    %14 = vector.broadcast %cst_14 : f32 to vector<8x1xf32>
    %15 = arith.mulf %10, %14 : vector<8x1xf32>
    %cst_15 = arith.constant 0.010416667 : f32
    %16 = vector.broadcast %cst_15 : f32 to vector<8x1xf32>
    %17 = arith.mulf %13, %16 : vector<8x1xf32>
    %18 = arith.mulf %15, %15 : vector<8x1xf32>
    %19 = arith.subf %17, %18 : vector<8x1xf32>
    %20 = vector.broadcast %15 : vector<8x1xf32> to vector<8x384xf32>
    %21 = arith.subf %6, %20 : vector<8x384xf32>
    %cst_16 = arith.constant 1.000000e-03 : f32
    %22 = vector.broadcast %cst_16 : f32 to vector<8x1xf32>
    %23 = arith.addf %19, %22 : vector<8x1xf32>
    %24 = math.rsqrt %23 : vector<8x1xf32>
    %25 = vector.broadcast %24 : vector<8x1xf32> to vector<8x384xf32>
    %26 = arith.mulf %21, %25 : vector<8x384xf32>
    %27 = vector.broadcast %7 : vector<1x384xf32> to vector<8x384xf32>
    %28 = arith.mulf %26, %27 : vector<8x384xf32>
    %29 = vector.broadcast %8 : vector<1x384xf32> to vector<8x384xf32>
    %30 = arith.addf %28, %29 : vector<8x384xf32>
    %31 = vector.extract_strided_slice %30 {offsets = [0, 0], sizes = [8, 128], strides = [1, 1]} : vector<8x384xf32> to vector<8x128xf32>
    %32 = arith.negf %31 : vector<8x128xf32>
    %33 = math.exp %32 : vector<8x128xf32>
    %cst_17 = arith.constant 1.000000e+00 : f32
    %34 = vector.broadcast %cst_17 : f32 to vector<8x128xf32>
    %35 = arith.addf %34, %33 : vector<8x128xf32>
    %36 = arith.divf %34, %35 : vector<8x128xf32>
    %37 = vector.extract_strided_slice %30 {offsets = [0, 128], sizes = [8, 128], strides = [1, 1]} : vector<8x384xf32> to vector<8x128xf32>
    %38 = arith.negf %37 : vector<8x128xf32>
    %39 = math.exp %38 : vector<8x128xf32>
    %cst_18 = arith.constant 1.000000e+00 : f32
    %40 = vector.broadcast %cst_18 : f32 to vector<8x128xf32>
    %41 = arith.addf %40, %39 : vector<8x128xf32>
    %42 = arith.divf %40, %41 : vector<8x128xf32>
    %43 = vector.extract_strided_slice %30 {offsets = [0, 256], sizes = [8, 128], strides = [1, 1]} : vector<8x384xf32> to vector<8x128xf32>
    %44 = arith.mulf %36, %43 : vector<8x128xf32>
    %45 = math.tanh %44 : vector<8x128xf32>
    %46 = arith.subf %45, %0 : vector<8x128xf32>
    %47 = arith.mulf %42, %46 : vector<8x128xf32>
    %48 = arith.addf %0, %47 : vector<8x128xf32>
    %c0_19 = arith.constant 0 : index
    %c0_20 = arith.constant 0 : index
    %49 = vector.load %arg7[%c0_19, %c0_20] : memref<8x128xf32, #tpu.memory_space<vmem>>, vector<8x128xf32>
    tpu.vector_store %arg7[%c0_19, %c0_20], %48 {strides = array<i32>} : memref<8x128xf32, #tpu.memory_space<vmem>>, vector<8x128xf32>,
    return
  }
  func.func @transform_0(%arg0: i32) -> (i32, i32) {
    %c0_i32 = arith.constant 0 : i32
    %c0_i32_0 = arith.constant 0 : i32
    return %arg0, %c0_i32 : i32, i32
  }
  func.func @transform_1(%arg0: i32) -> (i32, i32) {
    %c0_i32 = arith.constant 0 : i32
    %c0_i32_0 = arith.constant 0 : i32
    return %arg0, %c0_i32 : i32, i32
  }
  func.func @transform_2(%arg0: i32) -> (i32, i32) {
    %c0_i32 = arith.constant 0 : i32
    %c0_i32_0 = arith.constant 0 : i32
    %c0_i32_1 = arith.constant 0 : i32
    return %c0_i32, %c0_i32_0 : i32, i32
  }
  func.func @transform_3(%arg0: i32) -> (i32, i32) {
    %c0_i32 = arith.constant 0 : i32
    %c0_i32_0 = arith.constant 0 : i32
    %c0_i32_1 = arith.constant 0 : i32
    return %c0_i32, %c0_i32_0 : i32, i32
  }
  func.func @transform_4(%arg0: i32) -> (i32, i32) {
    %c0_i32 = arith.constant 0 : i32
    %c0_i32_0 = arith.constant 0 : i32
    %c0_i32_1 = arith.constant 0 : i32
    return %c0_i32, %c0_i32_0 : i32, i32
  }
  func.func @transform_5(%arg0: i32) -> (i32, i32) {
    %c0_i32 = arith.constant 0 : i32
    %c0_i32_0 = arith.constant 0 : i32
    %c0_i32_1 = arith.constant 0 : i32
    return %c0_i32, %c0_i32_0 : i32, i32
  }
  func.func @transform_6(%arg0: i32) -> (i32, i32) {
    %c0_i32 = arith.constant 0 : i32
    %c0_i32_0 = arith.constant 0 : i32
    return %arg0, %c0_i32 : i32, i32
  }
}

module attributes {stable_mosaic.version = 11 : i64} {
  func.func @_cell_kernel(%arg0: i32, %arg1: memref<8x16xf32, #tpu.memory_space<vmem>>, %arg2: memref<8x128xf32, #tpu.memory_space<vmem>>, %arg3: memref<16x384xf32, #tpu.memory_space<vmem>>, %arg4: memref<128x384xf32, #tpu.memory_space<vmem>>, %arg5: memref<1x384xf32, #tpu.memory_space<vmem>>, %arg6: memref<1x384xf32, #tpu.memory_space<vmem>>, %arg7: memref<8x128xf32, #tpu.memory_space<vmem>>) attributes {dimension_semantics = [#tpu.dimension_semantics<parallel>], iteration_bounds = array<i64: 1>, scalar_prefetch = 0 : i64, scratch_operands = 0 : i64, tpu.core_type = #tpu.core_type<tc>, window_params = [{transform_indices = @transform_0, window_bounds = array<i64: 8, 16>}, {transform_indices = @transform_1, window_bounds = array<i64: 8, 128>}, {pipeline_mode = #tpu.pipeline_mode<synchronous>, transform_indices = @transform_2, window_bounds = array<i64: 16, 384>}, {pipeline_mode = #tpu.pipeline_mode<synchronous>, transform_indices = @transform_3, window_bounds = array<i64: 128, 384>}, {pipeline_mode = #tpu.pipeline_mode<synchronous>, transform_indices = @transform_4, window_bounds = array<i64: 1, 384>}, {pipeline_mode = #tpu.pipeline_mode<synchronous>, transform_indices = @transform_5, window_bounds = array<i64: 1, 384>}, {transform_indices = @transform_6, window_bounds = array<i64: 8, 128>}]} {
    %c0 = arith.constant 0 : index
    %c0_0 = arith.constant 0 : index
    %0 = vector.load %arg2[%c0, %c0_0] : memref<8x128xf32, #tpu.memory_space<vmem>>, vector<8x128xf32>
    %c0_1 = arith.constant 0 : index
    %c0_2 = arith.constant 0 : index
    %1 = vector.load %arg1[%c0_1, %c0_2] : memref<8x16xf32, #tpu.memory_space<vmem>>, vector<8x16xf32>
    %c0_3 = arith.constant 0 : index
    %c0_4 = arith.constant 0 : index
    %2 = vector.load %arg3[%c0_3, %c0_4] : memref<16x384xf32, #tpu.memory_space<vmem>>, vector<16x384xf32>
    %cst = arith.constant dense<0.000000e+00> : vector<8x384xf32>
    %3 = tpu.matmul %1, %2, %cst {dimension_numbers = #tpu.dot_dimension_numbers<[1], [0], [0], [1], [0, 0, 1, 1], [], []>} : vector<8x16xf32>, vector<16x384xf32>, vector<8x384xf32> -> vector<8x384xf32>
    %c0_5 = arith.constant 0 : index
    %c0_6 = arith.constant 0 : index
    %4 = vector.load %arg4[%c0_5, %c0_6] : memref<128x384xf32, #tpu.memory_space<vmem>>, vector<128x384xf32>
    %cst_7 = arith.constant dense<0.000000e+00> : vector<8x384xf32>
    %5 = tpu.matmul %0, %4, %cst_7 {dimension_numbers = #tpu.dot_dimension_numbers<[1], [0], [0], [1], [0, 0, 1, 1], [], []>} : vector<8x128xf32>, vector<128x384xf32>, vector<8x384xf32> -> vector<8x384xf32>
    %6 = arith.addf %3, %5 : vector<8x384xf32>
    %c0_8 = arith.constant 0 : index
    %c0_9 = arith.constant 0 : index
    %7 = vector.load %arg5[%c0_8, %c0_9] : memref<1x384xf32, #tpu.memory_space<vmem>>, vector<1x384xf32>
    %c0_10 = arith.constant 0 : index
    %c0_11 = arith.constant 0 : index
    %8 = vector.load %arg6[%c0_10, %c0_11] : memref<1x384xf32, #tpu.memory_space<vmem>>, vector<1x384xf32>
    %cst_12 = arith.constant dense<0.000000e+00> : vector<8xf32>
    %9 = vector.multi_reduction <add>, %6, %cst_12 [1] : vector<8x384xf32> to vector<8xf32>
    %10 = vector.shape_cast %9 : vector<8xf32> to vector<8x1xf32>
    %11 = arith.mulf %6, %6 : vector<8x384xf32>
    %cst_13 = arith.constant dense<0.000000e+00> : vector<8xf32>
    %12 = vector.multi_reduction <add>, %11, %cst_13 [1] : vector<8x384xf32> to vector<8xf32>
    %13 = vector.shape_cast %12 : vector<8xf32> to vector<8x1xf32>
    %cst_14 = arith.constant 0.010416667 : f32
    %14 = vector.broadcast %cst_14 : f32 to vector<8x1xf32>
    %15 = arith.mulf %10, %14 : vector<8x1xf32>
    %cst_15 = arith.constant 0.010416667 : f32
    %16 = vector.broadcast %cst_15 : f32 to vector<8x1xf32>
    %17 = arith.mulf %13, %16 : vector<8x1xf32>
    %18 = arith.mulf %15, %15 : vector<8x1xf32>
    %19 = arith.subf %17, %18 : vector<8x1xf32>
    %20 = vector.broadcast %15 : vector<8x1xf32> to vector<8x384xf32>
    %21 = arith.subf %6, %20 : vector<8x384xf32>
    %cst_16 = arith.constant 1.000000e-03 : f32
    %22 = vector.broadcast %cst_16 : f32 to vector<8x1xf32>
    %23 = arith.addf %19, %22 : vector<8x1xf32>
    %24 = math.rsqrt %23 : vector<8x1xf32>
    %25 = vector.broadcast %24 : vector<8x1xf32> to vector<8x384xf32>
    %26 = arith.mulf %21, %25 : vector<8x384xf32>
    %27 = vector.broadcast %7 : vector<1x384xf32> to vector<8x384xf32>
    %28 = arith.mulf %26, %27 : vector<8x384xf32>
    %29 = vector.broadcast %8 : vector<1x384xf32> to vector<8x384xf32>
    %30 = arith.addf %28, %29 : vector<8x384xf32>
    %31 = vector.extract_strided_slice %30 {offsets = [0, 0], sizes = [8, 128], strides = [1, 1]} : vector<8x384xf32> to vector<8x128xf32>
    %32 = arith.negf %31 : vector<8x128xf32>
    %33 = math.exp %32 : vector<8x128xf32>
    %cst_17 = arith.constant 1.000000e+00 : f32
    %34 = vector.broadcast %cst_17 : f32 to vector<8x128xf32>
    %35 = arith.addf %34, %33 : vector<8x128xf32>
    %36 = arith.divf %34, %35 : vector<8x128xf32>
    %37 = vector.extract_strided_slice %30 {offsets = [0, 128], sizes = [8, 128], strides = [1, 1]} : vector<8x384xf32> to vector<8x128xf32>
    %38 = arith.negf %37 : vector<8x128xf32>
    %39 = math.exp %38 : vector<8x128xf32>
    %cst_18 = arith.constant 1.000000e+00 : f32
    %40 = vector.broadcast %cst_18 : f32 to vector<8x128xf32>
    %41 = arith.addf %40, %39 : vector<8x128xf32>
    %42 = arith.divf %40, %41 : vector<8x128xf32>
    %43 = vector.extract_strided_slice %30 {offsets = [0, 256], sizes = [8, 128], strides = [1, 1]} : vector<8x384xf32> to vector<8x128xf32>
    %44 = arith.mulf %36, %43 : vector<8x128xf32>
    %45 = math.tanh %44 : vector<8x128xf32>
    %46 = arith.subf %45, %0 : vector<8x128xf32>
    %47 = arith.mulf %42, %46 : vector<8x128xf32>
    %48 = arith.addf %0, %47 : vector<8x128xf32>
    %c0_19 = arith.constant 0 : index
    %c0_20 = arith.constant 0 : index
    %49 = vector.load %arg7[%c0_19, %c0_20] : memref<8x128xf32, #tpu.memory_space<vmem>>, vector<8x128xf32>
    tpu.vector_store %arg7[%c0_19, %c0_20], %48 {strides = array<i32>} : memref<8x128xf32, #tpu.memory_space<vmem>>, vector<8x128xf32>,
    return
  }
  func.func @transform_0(%arg0: i32) -> (i32, i32) {
    %c0_i32 = arith.constant 0 : i32
    %c0_i32_0 = arith.constant 0 : i32
    return %arg0, %c0_i32 : i32, i32
  }
  func.func @transform_1(%arg0: i32) -> (i32, i32) {
    %c0_i32 = arith.constant 0 : i32
    %c0_i32_0 = arith.constant 0 : i32
    return %arg0, %c0_i32 : i32, i32
  }
  func.func @transform_2(%arg0: i32) -> (i32, i32) {
    %c0_i32 = arith.constant 0 : i32
    %c0_i32_0 = arith.constant 0 : i32
    %c0_i32_1 = arith.constant 0 : i32
    return %c0_i32, %c0_i32_0 : i32, i32
  }
  func.func @transform_3(%arg0: i32) -> (i32, i32) {
    %c0_i32 = arith.constant 0 : i32
    %c0_i32_0 = arith.constant 0 : i32
    %c0_i32_1 = arith.constant 0 : i32
    return %c0_i32, %c0_i32_0 : i32, i32
  }
  func.func @transform_4(%arg0: i32) -> (i32, i32) {
    %c0_i32 = arith.constant 0 : i32
    %c0_i32_0 = arith.constant 0 : i32
    %c0_i32_1 = arith.constant 0 : i32
    return %c0_i32, %c0_i32_0 : i32, i32
  }
  func.func @transform_5(%arg0: i32) -> (i32, i32) {
    %c0_i32 = arith.constant 0 : i32
    %c0_i32_0 = arith.constant 0 : i32
    %c0_i32_1 = arith.constant 0 : i32
    return %c0_i32, %c0_i32_0 : i32, i32
  }
  func.func @transform_6(%arg0: i32) -> (i32, i32) {
    %c0_i32 = arith.constant 0 : i32
    %c0_i32_0 = arith.constant 0 : i32
    return %arg0, %c0_i32 : i32, i32
  }
}

</mosaic_0001>

<bundles_post_ra>
// kernel: tpu_custom_call.1
= control target key start
LH: loop header
LB: loop body
LE: loop exit
PB: predicated region body
PF: predicated region fallthrough
CT: control target
= control target key end

     0   :  { %11 = vsyncpa [#allocation3], 0  ;;  %s920_s0 = inlined_call_operand.hbm [shape: f32[8,16], index: 0, kind: input, shape index: {}]   ;;  %s921_s1 = inlined_call_operand.hbm [shape: f32[8,128], index: 1, kind: input, shape index: {}]   ;;  %s922_s2 = inlined_call_operand.hbm [shape: f32[16,384], index: 2, kind: input, shape index: {}]   ;;  %s923_s3 = inlined_call_operand.hbm [shape: f32[128,384], index: 3, kind: input, shape index: {}]   ;;  %s924_s4 = inlined_call_operand.vmem [shape: f32[1,384], index: 4, kind: input, shape index: {}]   ;;  %s925_s5 = inlined_call_operand.vmem [shape: f32[1,384], index: 5, kind: input, shape index: {}]   ;;  %s926_s6 = inlined_call_operand.hbm [shape: f32[8,128], index: 6, kind: output, shape index: {}]  }
   0x1   :  { %12 = vsyncpa [#allocation6], 0 }
   0x2   :  { %13 = vsyncpa [#allocation9], 0 }
   0x3   :  { %14 = vsyncpa [#allocation4], 0  ;;  %s788_s21 = smov [#allocation5]   ;;  %s789_s23 = smov [#allocation2]  }
   0x4   :  { %s31_s22 = sshll.u32 %s788_s21, 4  ;;  %s21_s24 = sshll.u32 %s789_s23, 4  ;;  %s32_s22 = int_to_ptr.vmem [resolvable:$true] %s31_s22  ;;  %s22_s24 = int_to_ptr.vmem [resolvable:$true] %s21_s24 }
   0x5   :  { %s670_s27 = scalar_lea.hbm %s921_s1, 128 }
   0x6   :  { %p671_p0 = scmp.ne.s32.totalorder %s921_s1, %s670_s27  ;;  %p674_p1 = scmp.lt.u32.totalorder %s670_s27, %s921_s1 }
   0x8   :  { %p676_p2 = pnand %p674_p1, %p671_p0 }
   0xa   :  { %679 = shalt.err (!%p676_p2)
}
   0xb   :  { %s680_s8 = scalar_lea.vmem %s32_s22, 128  ;;  %p685_p4 = scmp.lt.s32.totalorder %s32_s22, %s32_s22 }
   0xc   :  { %p681_p3 = scmp.ne.s32.totalorder %s32_s22, %s680_s8  ;;  %p686_p5 = scmp.lt.s32.totalorder %s680_s8, %s680_s8 }
   0xe   :  { %p687_p6 = por %p686_p5, %p685_p4 }
  0x10   :  { %p688_p7 = pnand %p687_p6, %p681_p3 }
  0x12   :  { %691 = shalt.err (!%p688_p7)
}
  0x13   :  { %34 = dma.hbm_to_vmem [thread:$0]  %s921_s1, 128, %s32_s22, [#allocation6]  }
  0x14   :  { %s692_s13 = scalar_lea.hbm %s920_s0, 128 }
  0x15   :  { %p693_p8 = scmp.ne.s32.totalorder %s920_s0, %s692_s13  ;;  %p696_p9 = scmp.lt.u32.totalorder %s692_s13, %s920_s0 }
  0x17   :  { %p698_p10 = pnand %p696_p9, %p693_p8 }
  0x19   :  { %701 = shalt.err (!%p698_p10)
}
  0x1a   :  { %s702_s18 = scalar_lea.vmem %s22_s24, 128  ;;  %p707_p12 = scmp.lt.s32.totalorder %s22_s24, %s22_s24 }
  0x1b   :  { %p703_p11 = scmp.ne.s32.totalorder %s22_s24, %s702_s18  ;;  %p708_p13 = scmp.lt.s32.totalorder %s702_s18, %s702_s18 }
  0x1d   :  { %p709_p0 = por %p708_p13, %p707_p12 }
  0x1f   :  { %p710_p1 = pnand %p709_p0, %p703_p11 }
  0x21   :  { %713 = shalt.err (!%p710_p1)
}
  0x22   :  { %24 = dma.hbm_to_vmem [thread:$0]  %s920_s0, 128, %s22_s24, [#allocation3]  }
  0x23   :  { %s790_s20 = smov [#allocation7]   ;;  %s714_s25 = scalar_lea.hbm %s922_s2, 768 }
  0x24   :  { %s40_s21 = sshll.u32 %s790_s20, 4  ;;  %p715_p2 = scmp.ne.s32.totalorder %s922_s2, %s714_s25  ;;  %s41_s21 = int_to_ptr.vmem [resolvable:$true] %s40_s21 }
  0x25   :  { %p718_p3 = scmp.lt.u32.totalorder %s714_s25, %s922_s2 }
  0x27   :  { %p720_p4 = pnand %p718_p3, %p715_p2 }
  0x29   :  { %723 = shalt.err (!%p720_p4)
}
  0x2a   :  { %s724_s30 = scalar_lea.vmem %s41_s21, 768  ;;  %p729_p6 = scmp.lt.s32.totalorder %s41_s21, %s41_s21 }
  0x2b   :  { %p725_p5 = scmp.ne.s32.totalorder %s41_s21, %s724_s30  ;;  %p730_p7 = scmp.lt.s32.totalorder %s724_s30, %s724_s30 }
  0x2d   :  { %p731_p8 = por %p730_p7, %p729_p6 }
  0x2f   :  { %p732_p9 = pnand %p731_p8, %p725_p5 }
  0x31   :  { %735 = shalt.err (!%p732_p9)
}
  0x32   :  { %s791_s0 = smov 384   ;;  %s792_s24 = smov 24  }
  0x33   :  { %46 = dma.hbm_to_vmem [thread:$0]  %s922_s2, 768, %s41_s21, [#allocation6], %s791_s0, %s791_s0, %s792_s24  }
  0x34   :  { %s793_s9 = smov [#allocation8]   ;;  %s736_s13 = scalar_lea.hbm %s923_s3, 6144 }
  0x35   :  { %s52_s10 = sshll.u32 %s793_s9, 4  ;;  %p737_p10 = scmp.ne.s32.totalorder %s923_s3, %s736_s13  ;;  %s53_s10 = int_to_ptr.vmem [resolvable:$true] %s52_s10 }
  0x36   :  { %p740_p11 = scmp.lt.u32.totalorder %s736_s13, %s923_s3 }
  0x38   :  { %p742_p12 = pnand %p740_p11, %p737_p10 }
  0x3a   :  { %745 = shalt.err (!%p742_p12)
}
  0x3b   :  { %s746_s18 = scalar_lea.vmem %s53_s10, 6144  ;;  %p751_p0 = scmp.lt.s32.totalorder %s53_s10, %s53_s10 }
  0x3c   :  { %p747_p13 = scmp.ne.s32.totalorder %s53_s10, %s746_s18  ;;  %p752_p1 = scmp.lt.s32.totalorder %s746_s18, %s746_s18 }
  0x3e   :  { %p753_p2 = por %p752_p1, %p751_p0 }
  0x40   :  { %p754_p3 = pnand %p753_p2, %p747_p13 }
  0x42   :  { %757 = shalt.err (!%p754_p3)
}
  0x43   :  { %58 = dma.hbm_to_vmem [thread:$0]  %s923_s3, 6144, %s53_s10, [#allocation9], %s791_s0, %s791_s0, %s792_s24  }
  0x44   :  { %780 = dma.done.wait [#allocation3], 128  }
  0x45   :  { %781 = vsyncadd [#allocation3], 4294967168 }
  0x46   :  { %782 = dma.done.wait [#allocation6], 896  }
  0x47   :  { %783 = vsyncadd [#allocation6], 4294966400 }
  0x48   :  { %784 = dma.done.wait [#allocation9], 6144  }
  0x49   :  { %785 = vsyncadd [#allocation9], 4294961152  ;;  %v794_v0 = vmov 0.0|0.0   ;;  %vm795_vm0 = vmmov 0   ;;  %v796_v1 = vmov 0.0   ;;  %v84_v2 = vld [vmem:[#allocation8 + $0x8] sm:$0xff] }
  0x4a   :  { %613 = vmatprep.subr.bf16.mxu1 %v794_v0  ;;  %571 = vmatprep.mubr.msk.f32.mxu1 %vm795_vm0, %v796_v1  ;;  %v87_v3 = vld [vmem:[#allocation8 + $0x20] sm:$0xff]  ;;  %v85_v4 = vld [vmem:[#allocation8 + $0x10] sm:$0xff]  ;;  %v88_v6 = vld [vmem:[#allocation8 + $0x28] sm:$0xff]  ;;  %vm272_vm1 = vcmask 130048  }
  0x4b   :  { %195 = vmatprep.mubr.f32.mxu0 %v796_v1  ;;  %v581_v5 = vpack.c.bf16 %v87_v3, %v84_v2  ;;  %v83_v7 = vld [vmem:[#allocation8] sm:$0xff]  ;;  %v86_v8 = vld [vmem:[#allocation8 + $0x18] sm:$0xff]  ;;  %v614_v9 = vpack.c.bf16 %v88_v6, %v85_v4  ;;  %v93_v12 = vld [vmem:[#allocation8 + $0x50] sm:$0xff] }
  0x4c   :  { %v583_v10 = vpack.c.bf16 %v86_v8, %v83_v7  ;;  %v90_v11 = vld [vmem:[#allocation8 + $0x38] sm:$0xff]  ;;  %v91_v13 = vld [vmem:[#allocation8 + $0x40] sm:$0xff]  ;;  %v89_v16 = vld [vmem:[#allocation8 + $0x30] sm:$0xff] }
  0x4d   :  { %582 = vmatprep.subr.bf16.mxu0 %v581_v5  ;;  %v585_v14 = vpack.c.bf16 %v93_v12, %v90_v11  ;;  %v94_v15 = vld [vmem:[#allocation8 + $0x58] sm:$0xff]  ;;  %v92_v17 = vld [vmem:[#allocation8 + $0x48] sm:$0xff]  ;;  %615 = vmatpush3.bf16.msra.mxu1 %v614_v9  ;;  %v99_v21 = vld [vmem:[#allocation8 + $0x80] sm:$0xff] }
  0x4e   :  { %584 = vmatpush1.bf16.msra.mxu0 %v583_v10  ;;  %v617_v18 = vpack.c.bf16 %v94_v15, %v91_v13  ;;  %v587_v19 = vpack.c.bf16 %v92_v17, %v89_v16  ;;  %v96_v20 = vld [vmem:[#allocation8 + $0x68] sm:$0xff]  ;;  %v97_v22 = vld [vmem:[#allocation8 + $0x70] sm:$0xff]  ;;  %616 = vmatprep.subr.bf16.mxu1 %v794_v0  ;;  %v95_v25 = vld [vmem:[#allocation8 + $0x60] sm:$0xff] }
  0x4f   :  { %586 = vmatprep.subr.bf16.mxu0 %v585_v14  ;;  %v589_v23 = vpack.c.bf16 %v99_v21, %v96_v20  ;;  %v100_v24 = vld [vmem:[#allocation8 + $0x88] sm:$0xff]  ;;  %v98_v26 = vld [vmem:[#allocation8 + $0x78] sm:$0xff]  ;;  %v105_v28 = vld [vmem:[#allocation8 + $0xb0] sm:$0xff] }
  0x50   :  { %v102_v27 = vld [vmem:[#allocation8 + $0x98] sm:$0xff]  ;;  %v620_v29 = vpack.c.bf16 %v100_v24, %v97_v22  ;;  %v591_v30 = vpack.c.bf16 %v98_v26, %v95_v25  ;;  %v103_v31 = vld [vmem:[#allocation8 + $0xa0] sm:$0xff]  ;;  %v101_v34 = vld [vmem:[#allocation8 + $0x90] sm:$0xff] }
  0x51   :  { %618 = vmatpush3.bf16.msra.mxu1 %v617_v18  ;;  %v593_v32 = vpack.c.bf16 %v105_v28, %v102_v27  ;;  %v106_v33 = vld [vmem:[#allocation8 + $0xb8] sm:$0xff]  ;;  %v104_v35 = vld [vmem:[#allocation8 + $0xa8] sm:$0xff]  ;;  %v111_v37 = vld [vmem:[#allocation8 + $0xe0] sm:$0xff] }
  0x52   :  { %588 = vmatpush1.bf16.msra.mxu0 %v587_v19  ;;  %619 = vmatprep.subr.bf16.mxu1 %v794_v0  ;;  %v108_v36 = vld [vmem:[#allocation8 + $0xc8] sm:$0xff]  ;;  %v623_v38 = vpack.c.bf16 %v106_v33, %v103_v31  ;;  %v595_v39 = vpack.c.bf16 %v104_v35, %v101_v34  ;;  %v109_v40 = vld [vmem:[#allocation8 + $0xd0] sm:$0xff]  ;;  %v107_v43 = vld [vmem:[#allocation8 + $0xc0] sm:$0xff] }
  0x53   :  { %590 = vmatprep.subr.bf16.mxu0 %v589_v23  ;;  %v597_v41 = vpack.c.bf16 %v111_v37, %v108_v36  ;;  %v112_v42 = vld [vmem:[#allocation8 + $0xe8] sm:$0xff]  ;;  %v110_v44 = vld [vmem:[#allocation8 + $0xd8] sm:$0xff]  ;;  %v117_v46 = vld [vmem:[#allocation8 + $0x110] sm:$0xff] }
  0x54   :  { %v114_v45 = vld [vmem:[#allocation8 + $0xf8] sm:$0xff]  ;;  %v626_v47 = vpack.c.bf16 %v112_v42, %v109_v40  ;;  %v599_v48 = vpack.c.bf16 %v110_v44, %v107_v43  ;;  %v115_v49 = vld [vmem:[#allocation8 + $0x100] sm:$0xff]  ;;  %v113_v52 = vld [vmem:[#allocation8 + $0xf0] sm:$0xff] }
  0x55   :  { %621 = vmatpush3.bf16.msra.mxu1 %v620_v29  ;;  %v601_v50 = vpack.c.bf16 %v117_v46, %v114_v45  ;;  %v118_v51 = vld [vmem:[#allocation8 + $0x118] sm:$0xff]  ;;  %v116_v53 = vld [vmem:[#allocation8 + $0x108] sm:$0xff]  ;;  %v123_v55 = vld [vmem:[#allocation8 + $0x140] sm:$0xff] }
  0x56   :  { %592 = vmatpush1.bf16.msra.mxu0 %v591_v30  ;;  %622 = vmatprep.subr.bf16.mxu1 %v794_v0  ;;  %v120_v54 = vld [vmem:[#allocation8 + $0x128] sm:$0xff]  ;;  %v629_v56 = vpack.c.bf16 %v118_v51, %v115_v49  ;;  %v603_v57 = vpack.c.bf16 %v116_v53, %v113_v52  ;;  %v121_v58 = vld [vmem:[#allocation8 + $0x130] sm:$0xff]  ;;  %v119_v61 = vld [vmem:[#allocation8 + $0x120] sm:$0xff] }
  0x57   :  { %594 = vmatprep.subr.bf16.mxu0 %v593_v32  ;;  %v605_v59 = vpack.c.bf16 %v123_v55, %v120_v54  ;;  %v124_v60 = vld [vmem:[#allocation8 + $0x148] sm:$0xff]  ;;  %v122_v62 = vld [vmem:[#allocation8 + $0x138] sm:$0xff]  ;;  %v129_v2 = vld [vmem:[#allocation8 + $0x170] sm:$0xff] }
  0x58   :  { %v126_v63 = vld [vmem:[#allocation8 + $0x158] sm:$0xff]  ;;  %v632_v3 = vpack.c.bf16 %v124_v60, %v121_v58  ;;  %v607_v4 = vpack.c.bf16 %v122_v62, %v119_v61  ;;  %v127_v5 = vld [vmem:[#allocation8 + $0x160] sm:$0xff]  ;;  %v125_v8 = vld [vmem:[#allocation8 + $0x150] sm:$0xff] }
  0x59   :  { %624 = vmatpush3.bf16.msra.mxu1 %v623_v38  ;;  %v609_v6 = vpack.c.bf16 %v129_v2, %v126_v63  ;;  %v130_v7 = vld [vmem:[#allocation8 + $0x178] sm:$0xff]  ;;  %v128_v9 = vld [vmem:[#allocation8 + $0x168] sm:$0xff]  ;;  %v81_v11 = vld [vmem:[#allocation7 + $0x20] sm:$0xff]  ;;  %v443_v38 = vlaneseq }
  0x5a   :  { %596 = vmatpush1.bf16.msra.mxu0 %v595_v39  ;;  %625 = vmatprep.subr.bf16.mxu1 %v794_v0  ;;  %v78_v10 = vld [vmem:[#allocation7 + $0x8] sm:$0xff]  ;;  %v635_v12 = vpack.c.bf16 %v130_v7, %v127_v5  ;;  %v611_v13 = vpack.c.bf16 %v128_v9, %v125_v8  ;;  %v77_v14 = vld [vmem:[#allocation7] sm:$0xff]  ;;  %v80_v16 = vld [vmem:[#allocation7 + $0x18] sm:$0xff] }
  0x5b   :  { %598 = vmatprep.subr.bf16.mxu0 %v597_v41  ;;  %v637_v15 = vpack.c.bf16 %v81_v11, %v78_v10  ;;  %v79_v17 = vld [vmem:[#allocation7 + $0x10] sm:$0xff]  ;;  %v82_v18 = vld [vmem:[#allocation7 + $0x28] sm:$0xff]  ;;  %v892_v19 = vld [vmem:[#allocation5] sm:$0xff]  ;;  %v639_v20 = vpack.c.bf16 %v80_v16, %v77_v14  ;;  %v444_v40 = vshrl.u32 %v443_v38, 7 }
  0x5c   :  { %v642_v21 = vpack.c.bf16 %v82_v18, %v79_v17  ;;  %v76_v22 = vld [vmem:[#allocation2] sm:$0xff] }
  0x5d   :  { %627 = vmatpush3.bf16.msra.mxu1 %v626_v47  ;;  %v445_v41 = vsub.s32 0, %v444_v40  ;;  %v417_v42 = vld [vmem:[%s924_s4] sm:$0x7]  ;;  %v449_v47 = vsub.s32 1, %v444_v40  ;;  %v453_v61 = vsub.s32 2, %v444_v40  ;;  %s797_s4 = smov [#allocation10]  }
  0x5e   :  { %600 = vmatpush1.bf16.msra.mxu0 %v599_v48  ;;  %628 = vmatprep.subr.bf16.mxu1 %v794_v0  ;;  %v418_v43 = vld [vmem:[%s925_s5] sm:$0x7]  ;;  %s504_s5 = sshll.u32 %s797_s4, 4  ;;  %s505_s5 = int_to_ptr.vmem [resolvable:$true] %s504_s5 }
  0x5f   :  { %602 = vmatprep.subr.bf16.mxu0 %v601_v50  ;;  %v446_v45 = vrot.slane %v417_v42, %v445_v41  ;;  %v465_v49 = vrot.slane %v418_v43, %v445_v41  ;;  %v450_v53 = vrot.slane %v417_v42, %v449_v47  ;;  %v473_v5 = vrot.slane %v418_v43, %v453_v61  ;;  %s758_s22 = scalar_lea.vmem %s505_s5, 128  ;;  %p763_p5 = scmp.lt.s32.totalorder %s505_s5, %s505_s5 }
  0x60   :  { %p759_p4 = scmp.ne.s32.totalorder %s505_s5, %s758_s22  ;;  %p764_p6 = scmp.lt.s32.totalorder %s758_s22, %s758_s22 }
  0x61   :  { %630 = vmatpush3.bf16.msra.mxu1 %v629_v56 }
  0x62   :  { %604 = vmatpush1.bf16.msra.mxu0 %v603_v57  ;;  %631 = vmatprep.subr.bf16.mxu1 %v794_v0  ;;  %v469_v57 = vrot.slane %v418_v43, %v449_v47  ;;  %p765_p7 = por %p764_p6, %p763_p5 }
  0x63   :  { %606 = vmatprep.subr.bf16.mxu0 %v605_v59 }
  0x64   :  { %p766_p8 = pnand %p765_p7, %p759_p4 }
  0x65   :  { %633 = vmatpush3.bf16.msra.mxu1 %v632_v3  ;;  %v454_v3 = vrot.slane %v417_v42, %v453_v61 }
  0x66   :  { %608 = vmatpush1.bf16.msra.mxu0 %v607_v4  ;;  %634 = vmatprep.subr.bf16.mxu1 %v794_v0 }
  0x67   :  { %610 = vmatprep.subr.bf16.mxu0 %v609_v6 }
  0x69   :  { %636 = vmatpush3.bf16.msra.mxu1 %v635_v12 }
  0x6a   :  { %612 = vmatpush1.bf16.msra.mxu0 %v611_v13  ;;  %641 = vmatprep.subr.bf16.mxu1 %v794_v0 }
  0x6b   :  { %638 = vmatprep.subr.bf16.mxu0 %v637_v15 }
  0x6c   :  { %572 = vmatmul.mubr.f32.vlgmr.msra.gmra.mrb[0].mxu1 %v892_v19 }
  0x6d   :  { %196 = vmatmul.mubr.f32.vlgmr.msra.gmra.mrb[0].mxu0 %v892_v19  ;;  %643 = vmatpush3.bf16.msra.mxu1 %v642_v21 }
  0x6e   :  { %640 = vmatpush1.bf16.msra.mxu0 %v639_v20  ;;  %578 = vmatprep.mubr.msk.f32.mxu1 %vm795_vm0, %v796_v1 }
  0x6f   :  { %340 = vmatprep.mubr.f32.mxu0 %v796_v1 }
  0x74   :  { %579 = vmatmul.mubr.msk.f32.vlgmr.msra.gmra.mrb[0].mxu1 %vm272_vm1, %v76_v22 }
  0x75   :  { %515 = vmatmul.mubr.msk.f32.vlgmr.msra.gmra.mrb[0].mxu0 %vm272_vm1, %v76_v22 }
 0x147   :  { %v413_v23 = vpop.f32.mrb[0].mxu1 }
 0x148   :  { %v342_v24 = vpop.f32.mrb[0].mxu0  ;;  %v580_v26 = vpop.f32.mrb[1].mxu1  ;;  %v425_v30 = vmul.f32 %v413_v23, %v413_v23 }
 0x149   :  { %v423_v25 = vmul.f32 %v342_v24, %v342_v24  ;;  %v344_v0 = vpop.f32.mrb[1].mxu0 }
 0x14a   :  { %v419_v27 = vadd.f32 %v344_v0, %v342_v24  ;;  %v424_v28 = vmul.f32 %v344_v0, %v344_v0 }
 0x14c   :  { %v420_v29 = vadd.f32 %v419_v27, %v413_v23  ;;  %v426_v31 = vadd.f32 %v424_v28, %v423_v25 }
 0x14e   :  { %421 = vadd.xlane.f32.xlu0 %v420_v29  ;;  %v427_v32 = vadd.f32 %v426_v31, %v425_v30 }
 0x152   :  { %428 = vadd.xlane.f32.xlu0 %v427_v32 }
 0x1db   :  { %v422_v33 = vpop.xlane.xlu0 %421 }
 0x1dc   :  { %v430_v34 = vmul.f32 0.010416667, %v422_v33 }
 0x1de   :  { %v432_v35 = vmul.f32 %v430_v34, %v430_v34  ;;  %v434_v44 = vsub.f32 %v342_v24, %v430_v34  ;;  %v435_v50 = vsub.f32 %v344_v0, %v430_v34  ;;  %v436_v63 = vsub.f32 %v413_v23, %v430_v34 }
 0x1df   :  { %v429_v1 = vpop.xlane.xlu0 %428 }
 0x1e0   :  { %v431_v36 = vmul.f32 0.010416667, %v429_v1 }
 0x1e2   :  { %v433_v37 = vsub.f32 %v431_v36, %v432_v35 }
 0x1e4   :  { %v437_v39 = vadd.f32 0.001, %v433_v37 }
 0x1e6   :  { %658 = vrsqrt.f32 %v437_v39 }
 0x1f0   :  { %v659_v46 = vpop.eup %658 }
 0x1f1   :  { %v439_v48 = vmul.f32 %v659_v46, %v434_v44  ;;  %v440_v52 = vmul.f32 %v659_v46, %v435_v50  ;;  %v441_v2 = vmul.f32 %v659_v46, %v436_v63 }
 0x1f3   :  { %v458_v51 = vmul.f32 %v446_v45, %v439_v48  ;;  %v459_v56 = vmul.f32 %v450_v53, %v440_v52  ;;  %v460_v4 = vmul.f32 %v454_v3, %v441_v2 }
 0x1f5   :  { %v477_v54 = vadd.f32 %v465_v49, %v458_v51  ;;  %v478_v58 = vadd.f32 %v469_v57, %v459_v56  ;;  %v479_v7 = vadd.f32 %v473_v5, %v460_v4 }
 0x1f7   :  { %v517_v55 = vmul.f32 -1.442695, %v477_v54  ;;  %v518_v59 = vmul.f32 -1.442695, %v478_v58 }
 0x1f9   :  { %660 = vpow2.f32 %v517_v55 }
 0x1fa   :  { %662 = vpow2.f32 %v518_v59 }
 0x203   :  { %v661_v60 = vpop.eup %660 }
 0x204   :  { %v483_v62 = vadd.f32 1.0, %v661_v60  ;;  %v663_v6 = vpop.eup %662 }
 0x205   :  { %v489_v9 = vadd.f32 1.0, %v663_v6 }
 0x206   :  { %664 = vrcp.f32 %v483_v62 }
 0x210   :  { %v665_v8 = vpop.eup %664 }
 0x211   :  { %v492_v10 = vmul.f32 %v665_v8, %v479_v7 }
 0x213   :  { %666 = vtanh.f32 %v492_v10 }
 0x214   :  { %668 = vrcp.f32 %v489_v9 }
 0x21d   :  { %v667_v11 = vpop.eup %666 }
 0x21e   :  { %v494_v12 = vsub.f32 %v667_v11, %v892_v19  ;;  %v669_v13 = vpop.eup %668 }
 0x220   :  { %v495_v14 = vmul.f32 %v669_v13, %v494_v12 }
 0x222   :  { %v496_v15 = vadd.f32 %v495_v14, %v892_v19 }
 0x224   :  { %497 = vst [vmem:[#allocation10] sm:$0xff] %v496_v15 }
 0x225   :  { %769 = shalt.err (!%p766_p8)
}
 0x226   :  { %s770_s26 = scalar_lea.hbm %s926_s6, 128 }
 0x227   :  { %p771_p9 = scmp.ne.s32.totalorder %s926_s6, %s770_s26  ;;  %p774_p10 = scmp.lt.u32.totalorder %s770_s26, %s926_s6 }
 0x229   :  { %p776_p11 = pnand %p774_p10, %p771_p9 }
 0x22b   :  { %779 = shalt.err (!%p776_p11)
}
 0x22c   :  { %507 = dma.vmem_to_hbm [thread:$0]  %s505_s5, 128, %s926_s6, [#allocation4]  }
 0x22d   :  { %786 = dma.done.wait [#allocation4], 128  }
 0x22e   :  { %787 = vsyncadd [#allocation4], 4294967168 }
 0x22f   :  { %511 = vsyncpa [#allocation3], 1 }
 0x230   :  { %512 = vsyncpa [#allocation6], 1 }
 0x231   :  { %513 = vsyncpa [#allocation9], 1 }
 0x232   :  { %514 = vsyncpa [#allocation4], 1 }

// kernel: tpu_custom_call.1
= control target key start
LH: loop header
LB: loop body
LE: loop exit
PB: predicated region body
PF: predicated region fallthrough
CT: control target
= control target key end

     0   :  { %11 = vsyncpa [#allocation3], 0  ;;  %s920_s0 = inlined_call_operand.hbm [shape: f32[8,16], index: 0, kind: input, shape index: {}]   ;;  %s921_s1 = inlined_call_operand.hbm [shape: f32[8,128], index: 1, kind: input, shape index: {}]   ;;  %s922_s2 = inlined_call_operand.hbm [shape: f32[16,384], index: 2, kind: input, shape index: {}]   ;;  %s923_s3 = inlined_call_operand.hbm [shape: f32[128,384], index: 3, kind: input, shape index: {}]   ;;  %s924_s4 = inlined_call_operand.vmem [shape: f32[1,384], index: 4, kind: input, shape index: {}]   ;;  %s925_s5 = inlined_call_operand.vmem [shape: f32[1,384], index: 5, kind: input, shape index: {}]   ;;  %s926_s6 = inlined_call_operand.hbm [shape: f32[8,128], index: 6, kind: output, shape index: {}]  }
   0x1   :  { %12 = vsyncpa [#allocation6], 0 }
   0x2   :  { %13 = vsyncpa [#allocation9], 0 }
   0x3   :  { %14 = vsyncpa [#allocation4], 0  ;;  %s788_s21 = smov [#allocation5]   ;;  %s789_s23 = smov [#allocation2]  }
   0x4   :  { %s31_s22 = sshll.u32 %s788_s21, 4  ;;  %s21_s24 = sshll.u32 %s789_s23, 4  ;;  %s32_s22 = int_to_ptr.vmem [resolvable:$true] %s31_s22  ;;  %s22_s24 = int_to_ptr.vmem [resolvable:$true] %s21_s24 }
   0x5   :  { %s670_s27 = scalar_lea.hbm %s921_s1, 128 }
   0x6   :  { %p671_p0 = scmp.ne.s32.totalorder %s921_s1, %s670_s27  ;;  %p674_p1 = scmp.lt.u32.totalorder %s670_s27, %s921_s1 }
   0x8   :  { %p676_p2 = pnand %p674_p1, %p671_p0 }
   0xa   :  { %679 = shalt.err (!%p676_p2)
}
   0xb   :  { %s680_s8 = scalar_lea.vmem %s32_s22, 128  ;;  %p685_p4 = scmp.lt.s32.totalorder %s32_s22, %s32_s22 }
   0xc   :  { %p681_p3 = scmp.ne.s32.totalorder %s32_s22, %s680_s8  ;;  %p686_p5 = scmp.lt.s32.totalorder %s680_s8, %s680_s8 }
   0xe   :  { %p687_p6 = por %p686_p5, %p685_p4 }
  0x10   :  { %p688_p7 = pnand %p687_p6, %p681_p3 }
  0x12   :  { %691 = shalt.err (!%p688_p7)
}
  0x13   :  { %34 = dma.hbm_to_vmem [thread:$0]  %s921_s1, 128, %s32_s22, [#allocation6]  }
  0x14   :  { %s692_s13 = scalar_lea.hbm %s920_s0, 128 }
  0x15   :  { %p693_p8 = scmp.ne.s32.totalorder %s920_s0, %s692_s13  ;;  %p696_p9 = scmp.lt.u32.totalorder %s692_s13, %s920_s0 }
  0x17   :  { %p698_p10 = pnand %p696_p9, %p693_p8 }
  0x19   :  { %701 = shalt.err (!%p698_p10)
}
  0x1a   :  { %s702_s18 = scalar_lea.vmem %s22_s24, 128  ;;  %p707_p12 = scmp.lt.s32.totalorder %s22_s24, %s22_s24 }
  0x1b   :  { %p703_p11 = scmp.ne.s32.totalorder %s22_s24, %s702_s18  ;;  %p708_p13 = scmp.lt.s32.totalorder %s702_s18, %s702_s18 }
  0x1d   :  { %p709_p0 = por %p708_p13, %p707_p12 }
  0x1f   :  { %p710_p1 = pnand %p709_p0, %p703_p11 }
  0x21   :  { %713 = shalt.err (!%p710_p1)
}
  0x22   :  { %24 = dma.hbm_to_vmem [thread:$0]  %s920_s0, 128, %s22_s24, [#allocation3]  }
  0x23   :  { %s790_s20 = smov [#allocation7]   ;;  %s714_s25 = scalar_lea.hbm %s922_s2, 768 }
  0x24   :  { %s40_s21 = sshll.u32 %s790_s20, 4  ;;  %p715_p2 = scmp.ne.s32.totalorder %s922_s2, %s714_s25  ;;  %s41_s21 = int_to_ptr.vmem [resolvable:$true] %s40_s21 }
  0x25   :  { %p718_p3 = scmp.lt.u32.totalorder %s714_s25, %s922_s2 }
  0x27   :  { %p720_p4 = pnand %p718_p3, %p715_p2 }
  0x29   :  { %723 = shalt.err (!%p720_p4)
}
  0x2a   :  { %s724_s30 = scalar_lea.vmem %s41_s21, 768  ;;  %p729_p6 = scmp.lt.s32.totalorder %s41_s21, %s41_s21 }
  0x2b   :  { %p725_p5 = scmp.ne.s32.totalorder %s41_s21, %s724_s30  ;;  %p730_p7 = scmp.lt.s32.totalorder %s724_s30, %s724_s30 }
  0x2d   :  { %p731_p8 = por %p730_p7, %p729_p6 }
  0x2f   :  { %p732_p9 = pnand %p731_p8, %p725_p5 }
  0x31   :  { %735 = shalt.err (!%p732_p9)
}
  0x32   :  { %s791_s0 = smov 384   ;;  %s792_s24 = smov 24  }
  0x33   :  { %46 = dma.hbm_to_vmem [thread:$0]  %s922_s2, 768, %s41_s21, [#allocation6], %s791_s0, %s791_s0, %s792_s24  }
  0x34   :  { %s793_s9 = smov [#allocation8]   ;;  %s736_s13 = scalar_lea.hbm %s923_s3, 6144 }
  0x35   :  { %s52_s10 = sshll.u32 %s793_s9, 4  ;;  %p737_p10 = scmp.ne.s32.totalorder %s923_s3, %s736_s13  ;;  %s53_s10 = int_to_ptr.vmem [resolvable:$true] %s52_s10 }
  0x36   :  { %p740_p11 = scmp.lt.u32.totalorder %s736_s13, %s923_s3 }
  0x38   :  { %p742_p12 = pnand %p740_p11, %p737_p10 }
  0x3a   :  { %745 = shalt.err (!%p742_p12)
}
  0x3b   :  { %s746_s18 = scalar_lea.vmem %s53_s10, 6144  ;;  %p751_p0 = scmp.lt.s32.totalorder %s53_s10, %s53_s10 }
  0x3c   :  { %p747_p13 = scmp.ne.s32.totalorder %s53_s10, %s746_s18  ;;  %p752_p1 = scmp.lt.s32.totalorder %s746_s18, %s746_s18 }
  0x3e   :  { %p753_p2 = por %p752_p1, %p751_p0 }
  0x40   :  { %p754_p3 = pnand %p753_p2, %p747_p13 }
  0x42   :  { %757 = shalt.err (!%p754_p3)
}
  0x43   :  { %58 = dma.hbm_to_vmem [thread:$0]  %s923_s3, 6144, %s53_s10, [#allocation9], %s791_s0, %s791_s0, %s792_s24  }
  0x44   :  { %780 = dma.done.wait [#allocation3], 128  }
  0x45   :  { %781 = vsyncadd [#allocation3], 4294967168 }
  0x46   :  { %782 = dma.done.wait [#allocation6], 896  }
  0x47   :  { %783 = vsyncadd [#allocation6], 4294966400 }
  0x48   :  { %784 = dma.done.wait [#allocation9], 6144  }
  0x49   :  { %785 = vsyncadd [#allocation9], 4294961152  ;;  %v794_v0 = vmov 0.0|0.0   ;;  %vm795_vm0 = vmmov 0   ;;  %v796_v1 = vmov 0.0   ;;  %v84_v2 = vld [vmem:[#allocation8 + $0x8] sm:$0xff] }
  0x4a   :  { %613 = vmatprep.subr.bf16.mxu1 %v794_v0  ;;  %571 = vmatprep.mubr.msk.f32.mxu1 %vm795_vm0, %v796_v1  ;;  %v87_v3 = vld [vmem:[#allocation8 + $0x20] sm:$0xff]  ;;  %v85_v4 = vld [vmem:[#allocation8 + $0x10] sm:$0xff]  ;;  %v88_v6 = vld [vmem:[#allocation8 + $0x28] sm:$0xff]  ;;  %vm272_vm1 = vcmask 130048  }
  0x4b   :  { %195 = vmatprep.mubr.f32.mxu0 %v796_v1  ;;  %v581_v5 = vpack.c.bf16 %v87_v3, %v84_v2  ;;  %v83_v7 = vld [vmem:[#allocation8] sm:$0xff]  ;;  %v86_v8 = vld [vmem:[#allocation8 + $0x18] sm:$0xff]  ;;  %v614_v9 = vpack.c.bf16 %v88_v6, %v85_v4  ;;  %v93_v12 = vld [vmem:[#allocation8 + $0x50] sm:$0xff] }
  0x4c   :  { %v583_v10 = vpack.c.bf16 %v86_v8, %v83_v7  ;;  %v90_v11 = vld [vmem:[#allocation8 + $0x38] sm:$0xff]  ;;  %v91_v13 = vld [vmem:[#allocation8 + $0x40] sm:$0xff]  ;;  %v89_v16 = vld [vmem:[#allocation8 + $0x30] sm:$0xff] }
  0x4d   :  { %582 = vmatprep.subr.bf16.mxu0 %v581_v5  ;;  %v585_v14 = vpack.c.bf16 %v93_v12, %v90_v11  ;;  %v94_v15 = vld [vmem:[#allocation8 + $0x58] sm:$0xff]  ;;  %v92_v17 = vld [vmem:[#allocation8 + $0x48] sm:$0xff]  ;;  %615 = vmatpush3.bf16.msra.mxu1 %v614_v9  ;;  %v99_v21 = vld [vmem:[#allocation8 + $0x80] sm:$0xff] }
  0x4e   :  { %584 = vmatpush1.bf16.msra.mxu0 %v583_v10  ;;  %v617_v18 = vpack.c.bf16 %v94_v15, %v91_v13  ;;  %v587_v19 = vpack.c.bf16 %v92_v17, %v89_v16  ;;  %v96_v20 = vld [vmem:[#allocation8 + $0x68] sm:$0xff]  ;;  %v97_v22 = vld [vmem:[#allocation8 + $0x70] sm:$0xff]  ;;  %616 = vmatprep.subr.bf16.mxu1 %v794_v0  ;;  %v95_v25 = vld [vmem:[#allocation8 + $0x60] sm:$0xff] }
  0x4f   :  { %586 = vmatprep.subr.bf16.mxu0 %v585_v14  ;;  %v589_v23 = vpack.c.bf16 %v99_v21, %v96_v20  ;;  %v100_v24 = vld [vmem:[#allocation8 + $0x88] sm:$0xff]  ;;  %v98_v26 = vld [vmem:[#allocation8 + $0x78] sm:$0xff]  ;;  %v105_v28 = vld [vmem:[#allocation8 + $0xb0] sm:$0xff] }
  0x50   :  { %v102_v27 = vld [vmem:[#allocation8 + $0x98] sm:$0xff]  ;;  %v620_v29 = vpack.c.bf16 %v100_v24, %v97_v22  ;;  %v591_v30 = vpack.c.bf16 %v98_v26, %v95_v25  ;;  %v103_v31 = vld [vmem:[#allocation8 + $0xa0] sm:$0xff]  ;;  %v101_v34 = vld [vmem:[#allocation8 + $0x90] sm:$0xff] }
  0x51   :  { %618 = vmatpush3.bf16.msra.mxu1 %v617_v18  ;;  %v593_v32 = vpack.c.bf16 %v105_v28, %v102_v27  ;;  %v106_v33 = vld [vmem:[#allocation8 + $0xb8] sm:$0xff]  ;;  %v104_v35 = vld [vmem:[#allocation8 + $0xa8] sm:$0xff]  ;;  %v111_v37 = vld [vmem:[#allocation8 + $0xe0] sm:$0xff] }
  0x52   :  { %588 = vmatpush1.bf16.msra.mxu0 %v587_v19  ;;  %619 = vmatprep.subr.bf16.mxu1 %v794_v0  ;;  %v108_v36 = vld [vmem:[#allocation8 + $0xc8] sm:$0xff]  ;;  %v623_v38 = vpack.c.bf16 %v106_v33, %v103_v31  ;;  %v595_v39 = vpack.c.bf16 %v104_v35, %v101_v34  ;;  %v109_v40 = vld [vmem:[#allocation8 + $0xd0] sm:$0xff]  ;;  %v107_v43 = vld [vmem:[#allocation8 + $0xc0] sm:$0xff] }
  0x53   :  { %590 = vmatprep.subr.bf16.mxu0 %v589_v23  ;;  %v597_v41 = vpack.c.bf16 %v111_v37, %v108_v36  ;;  %v112_v42 = vld [vmem:[#allocation8 + $0xe8] sm:$0xff]  ;;  %v110_v44 = vld [vmem:[#allocation8 + $0xd8] sm:$0xff]  ;;  %v117_v46 = vld [vmem:[#allocation8 + $0x110] sm:$0xff] }
  0x54   :  { %v114_v45 = vld [vmem:[#allocation8 + $0xf8] sm:$0xff]  ;;  %v626_v47 = vpack.c.bf16 %v112_v42, %v109_v40  ;;  %v599_v48 = vpack.c.bf16 %v110_v44, %v107_v43  ;;  %v115_v49 = vld [vmem:[#allocation8 + $0x100] sm:$0xff]  ;;  %v113_v52 = vld [vmem:[#allocation8 + $0xf0] sm:$0xff] }
  0x55   :  { %621 = vmatpush3.bf16.msra.mxu1 %v620_v29  ;;  %v601_v50 = vpack.c.bf16 %v117_v46, %v114_v45  ;;  %v118_v51 = vld [vmem:[#allocation8 + $0x118] sm:$0xff]  ;;  %v116_v53 = vld [vmem:[#allocation8 + $0x108] sm:$0xff]  ;;  %v123_v55 = vld [vmem:[#allocation8 + $0x140] sm:$0xff] }
  0x56   :  { %592 = vmatpush1.bf16.msra.mxu0 %v591_v30  ;;  %622 = vmatprep.subr.bf16.mxu1 %v794_v0  ;;  %v120_v54 = vld [vmem:[#allocation8 + $0x128] sm:$0xff]  ;;  %v629_v56 = vpack.c.bf16 %v118_v51, %v115_v49  ;;  %v603_v57 = vpack.c.bf16 %v116_v53, %v113_v52  ;;  %v121_v58 = vld [vmem:[#allocation8 + $0x130] sm:$0xff]  ;;  %v119_v61 = vld [vmem:[#allocation8 + $0x120] sm:$0xff] }
  0x57   :  { %594 = vmatprep.subr.bf16.mxu0 %v593_v32  ;;  %v605_v59 = vpack.c.bf16 %v123_v55, %v120_v54  ;;  %v124_v60 = vld [vmem:[#allocation8 + $0x148] sm:$0xff]  ;;  %v122_v62 = vld [vmem:[#allocation8 + $0x138] sm:$0xff]  ;;  %v129_v2 = vld [vmem:[#allocation8 + $0x170] sm:$0xff] }
  0x58   :  { %v126_v63 = vld [vmem:[#allocation8 + $0x158] sm:$0xff]  ;;  %v632_v3 = vpack.c.bf16 %v124_v60, %v121_v58  ;;  %v607_v4 = vpack.c.bf16 %v122_v62, %v119_v61  ;;  %v127_v5 = vld [vmem:[#allocation8 + $0x160] sm:$0xff]  ;;  %v125_v8 = vld [vmem:[#allocation8 + $0x150] sm:$0xff] }
  0x59   :  { %624 = vmatpush3.bf16.msra.mxu1 %v623_v38  ;;  %v609_v6 = vpack.c.bf16 %v129_v2, %v126_v63  ;;  %v130_v7 = vld [vmem:[#allocation8 + $0x178] sm:$0xff]  ;;  %v128_v9 = vld [vmem:[#allocation8 + $0x168] sm:$0xff]  ;;  %v81_v11 = vld [vmem:[#allocation7 + $0x20] sm:$0xff]  ;;  %v443_v38 = vlaneseq }
  0x5a   :  { %596 = vmatpush1.bf16.msra.mxu0 %v595_v39  ;;  %625 = vmatprep.subr.bf16.mxu1 %v794_v0  ;;  %v78_v10 = vld [vmem:[#allocation7 + $0x8] sm:$0xff]  ;;  %v635_v12 = vpack.c.bf16 %v130_v7, %v127_v5  ;;  %v611_v13 = vpack.c.bf16 %v128_v9, %v125_v8  ;;  %v77_v14 = vld [vmem:[#allocation7] sm:$0xff]  ;;  %v80_v16 = vld [vmem:[#allocation7 + $0x18] sm:$0xff] }
  0x5b   :  { %598 = vmatprep.subr.bf16.mxu0 %v597_v41  ;;  %v637_v15 = vpack.c.bf16 %v81_v11, %v78_v10  ;;  %v79_v17 = vld [vmem:[#allocation7 + $0x10] sm:$0xff]  ;;  %v82_v18 = vld [vmem:[#allocation7 + $0x28] sm:$0xff]  ;;  %v892_v19 = vld [vmem:[#allocation5] sm:$0xff]  ;;  %v639_v20 = vpack.c.bf16 %v80_v16, %v77_v14  ;;  %v444_v40 = vshrl.u32 %v443_v38, 7 }
  0x5c   :  { %v642_v21 = vpack.c.bf16 %v82_v18, %v79_v17  ;;  %v76_v22 = vld [vmem:[#allocation2] sm:$0xff] }
  0x5d   :  { %627 = vmatpush3.bf16.msra.mxu1 %v626_v47  ;;  %v445_v41 = vsub.s32 0, %v444_v40  ;;  %v417_v42 = vld [vmem:[%s924_s4] sm:$0x7]  ;;  %v449_v47 = vsub.s32 1, %v444_v40  ;;  %v453_v61 = vsub.s32 2, %v444_v40  ;;  %s797_s4 = smov [#allocation10]  }
  0x5e   :  { %600 = vmatpush1.bf16.msra.mxu0 %v599_v48  ;;  %628 = vmatprep.subr.bf16.mxu1 %v794_v0  ;;  %v418_v43 = vld [vmem:[%s925_s5] sm:$0x7]  ;;  %s504_s5 = sshll.u32 %s797_s4, 4  ;;  %s505_s5 = int_to_ptr.vmem [resolvable:$true] %s504_s5 }
  0x5f   :  { %602 = vmatprep.subr.bf16.mxu0 %v601_v50  ;;  %v446_v45 = vrot.slane %v417_v42, %v445_v41  ;;  %v465_v49 = vrot.slane %v418_v43, %v445_v41  ;;  %v450_v53 = vrot.slane %v417_v42, %v449_v47  ;;  %v473_v5 = vrot.slane %v418_v43, %v453_v61  ;;  %s758_s22 = scalar_lea.vmem %s505_s5, 128  ;;  %p763_p5 = scmp.lt.s32.totalorder %s505_s5, %s505_s5 }
  0x60   :  { %p759_p4 = scmp.ne.s32.totalorder %s505_s5, %s758_s22  ;;  %p764_p6 = scmp.lt.s32.totalorder %s758_s22, %s758_s22 }
  0x61   :  { %630 = vmatpush3.bf16.msra.mxu1 %v629_v56 }
  0x62   :  { %604 = vmatpush1.bf16.msra.mxu0 %v603_v57  ;;  %631 = vmatprep.subr.bf16.mxu1 %v794_v0  ;;  %v469_v57 = vrot.slane %v418_v43, %v449_v47  ;;  %p765_p7 = por %p764_p6, %p763_p5 }
  0x63   :  { %606 = vmatprep.subr.bf16.mxu0 %v605_v59 }
  0x64   :  { %p766_p8 = pnand %p765_p7, %p759_p4 }
  0x65   :  { %633 = vmatpush3.bf16.msra.mxu1 %v632_v3  ;;  %v454_v3 = vrot.slane %v417_v42, %v453_v61 }
  0x66   :  { %608 = vmatpush1.bf16.msra.mxu0 %v607_v4  ;;  %634 = vmatprep.subr.bf16.mxu1 %v794_v0 }
  0x67   :  { %610 = vmatprep.subr.bf16.mxu0 %v609_v6 }
  0x69   :  { %636 = vmatpush3.bf16.msra.mxu1 %v635_v12 }
  0x6a   :  { %612 = vmatpush1.bf16.msra.mxu0 %v611_v13  ;;  %641 = vmatprep.subr.bf16.mxu1 %v794_v0 }
  0x6b   :  { %638 = vmatprep.subr.bf16.mxu0 %v637_v15 }
  0x6c   :  { %572 = vmatmul.mubr.f32.vlgmr.msra.gmra.mrb[0].mxu1 %v892_v19 }
  0x6d   :  { %196 = vmatmul.mubr.f32.vlgmr.msra.gmra.mrb[0].mxu0 %v892_v19  ;;  %643 = vmatpush3.bf16.msra.mxu1 %v642_v21 }
  0x6e   :  { %640 = vmatpush1.bf16.msra.mxu0 %v639_v20  ;;  %578 = vmatprep.mubr.msk.f32.mxu1 %vm795_vm0, %v796_v1 }
  0x6f   :  { %340 = vmatprep.mubr.f32.mxu0 %v796_v1 }
  0x74   :  { %579 = vmatmul.mubr.msk.f32.vlgmr.msra.gmra.mrb[0].mxu1 %vm272_vm1, %v76_v22 }
  0x75   :  { %515 = vmatmul.mubr.msk.f32.vlgmr.msra.gmra.mrb[0].mxu0 %vm272_vm1, %v76_v22 }
 0x147   :  { %v413_v23 = vpop.f32.mrb[0].mxu1 }
 0x148   :  { %v342_v24 = vpop.f32.mrb[0].mxu0  ;;  %v580_v26 = vpop.f32.mrb[1].mxu1  ;;  %v425_v30 = vmul.f32 %v413_v23, %v413_v23 }
 0x149   :  { %v423_v25 = vmul.f32 %v342_v24, %v342_v24  ;;  %v344_v0 = vpop.f32.mrb[1].mxu0 }
 0x14a   :  { %v419_v27 = vadd.f32 %v344_v0, %v342_v24  ;;  %v424_v28 = vmul.f32 %v344_v0, %v344_v0 }
 0x14c   :  { %v420_v29 = vadd.f32 %v419_v27, %v413_v23  ;;  %v426_v31 = vadd.f32 %v424_v28, %v423_v25 }
 0x14e   :  { %421 = vadd.xlane.f32.xlu0 %v420_v29  ;;  %v427_v32 = vadd.f32 %v426_v31, %v425_v30 }
 0x152   :  { %428 = vadd.xlane.f32.xlu0 %v427_v32 }
 0x1db   :  { %v422_v33 = vpop.xlane.xlu0 %421 }
 0x1dc   :  { %v430_v34 = vmul.f32 0.010416667, %v422_v33 }
 0x1de   :  { %v432_v35 = vmul.f32 %v430_v34, %v430_v34  ;;  %v434_v44 = vsub.f32 %v342_v24, %v430_v34  ;;  %v435_v50 = vsub.f32 %v344_v0, %v430_v34  ;;  %v436_v63 = vsub.f32 %v413_v23, %v430_v34 }
 0x1df   :  { %v429_v1 = vpop.xlane.xlu0 %428 }
 0x1e0   :  { %v431_v36 = vmul.f32 0.010416667, %v429_v1 }
 0x1e2   :  { %v433_v37 = vsub.f32 %v431_v36, %v432_v35 }
 0x1e4   :  { %v437_v39 = vadd.f32 0.001, %v433_v37 }
 0x1e6   :  { %658 = vrsqrt.f32 %v437_v39 }
 0x1f0   :  { %v659_v46 = vpop.eup %658 }
 0x1f1   :  { %v439_v48 = vmul.f32 %v659_v46, %v434_v44  ;;  %v440_v52 = vmul.f32 %v659_v46, %v435_v50  ;;  %v441_v2 = vmul.f32 %v659_v46, %v436_v63 }
 0x1f3   :  { %v458_v51 = vmul.f32 %v446_v45, %v439_v48  ;;  %v459_v56 = vmul.f32 %v450_v53, %v440_v52  ;;  %v460_v4 = vmul.f32 %v454_v3, %v441_v2 }
 0x1f5   :  { %v477_v54 = vadd.f32 %v465_v49, %v458_v51  ;;  %v478_v58 = vadd.f32 %v469_v57, %v459_v56  ;;  %v479_v7 = vadd.f32 %v473_v5, %v460_v4 }
 0x1f7   :  { %v517_v55 = vmul.f32 -1.442695, %v477_v54  ;;  %v518_v59 = vmul.f32 -1.442695, %v478_v58 }
 0x1f9   :  { %660 = vpow2.f32 %v517_v55 }
 0x1fa   :  { %662 = vpow2.f32 %v518_v59 }
 0x203   :  { %v661_v60 = vpop.eup %660 }
 0x204   :  { %v483_v62 = vadd.f32 1.0, %v661_v60  ;;  %v663_v6 = vpop.eup %662 }
 0x205   :  { %v489_v9 = vadd.f32 1.0, %v663_v6 }
 0x206   :  { %664 = vrcp.f32 %v483_v62 }
 0x210   :  { %v665_v8 = vpop.eup %664 }
 0x211   :  { %v492_v10 = vmul.f32 %v665_v8, %v479_v7 }
 0x213   :  { %666 = vtanh.f32 %v492_v10 }
 0x214   :  { %668 = vrcp.f32 %v489_v9 }
 0x21d   :  { %v667_v11 = vpop.eup %666 }
 0x21e   :  { %v494_v12 = vsub.f32 %v667_v11, %v892_v19  ;;  %v669_v13 = vpop.eup %668 }
 0x220   :  { %v495_v14 = vmul.f32 %v669_v13, %v494_v12 }
 0x222   :  { %v496_v15 = vadd.f32 %v495_v14, %v892_v19 }
 0x224   :  { %497 = vst [vmem:[#allocation10] sm:$0xff] %v496_v15 }
 0x225   :  { %769 = shalt.err (!%p766_p8)
}
 0x226   :  { %s770_s26 = scalar_lea.hbm %s926_s6, 128 }
 0x227   :  { %p771_p9 = scmp.ne.s32.totalorder %s926_s6, %s770_s26  ;;  %p774_p10 = scmp.lt.u32.totalorder %s770_s26, %s926_s6 }
 0x229   :  { %p776_p11 = pnand %p774_p10, %p771_p9 }
 0x22b   :  { %779 = shalt.err (!%p776_p11)
}
 0x22c   :  { %507 = dma.vmem_to_hbm [thread:$0]  %s505_s5, 128, %s926_s6, [#allocation4]  }
 0x22d   :  { %786 = dma.done.wait [#allocation4], 128  }
 0x22e   :  { %787 = vsyncadd [#allocation4], 4294967168 }
 0x22f   :  { %511 = vsyncpa [#allocation3], 1 }
 0x230   :  { %512 = vsyncpa [#allocation6], 1 }
 0x231   :  { %513 = vsyncpa [#allocation9], 1 }
 0x232   :  { %514 = vsyncpa [#allocation4], 1 }

</bundles_post_ra>
